<compile_context>
chip_gen: v7x
topology: tpu7x:2x2x1
jax: 0.10.0
libtpu: 0.0.40
codegen_flags: <defaults>
</compile_context>

<pallas_src>
import functools

import jax
import jax.numpy as jnp
from jax import lax
from jax.experimental import pallas as pl
from jax.experimental.pallas import tpu as pltpu

EPS = 1e-5
_VMEM_LIMIT = 48 * 1024 * 1024   # v7x-safe (64 MiB physical VMEM per TC)


def _round_up(x, m):
    return ((x + m - 1) // m) * m


def _pick_tile(dim, align, cap):
    """Pick a tile size (multiple of `align`, <= cap) and the padded extent it divides."""
    dp = _round_up(dim, align)
    if dp <= cap:
        return dp, dp
    t = (cap // align) * align
    while dp % t:
        t -= align
    return t, dp


def _channel_tile(c, cap=512):
    """Channel (lane) tile: full extent if small, else a 128-multiple divisor <= cap."""
    if c <= cap or c % 128:
        return c
    t = (cap // 128) * 128
    while c % t:
        t -= 128
    return t


def _cpad(c):
    """Globally pad channel counts >=128 up to a multiple of 128 (728 -> 768)."""
    return c if c < 128 else _round_up(c, 128)


def _cparams(*sem):
    return pltpu.CompilerParams(dimension_semantics=sem, vmem_limit_bytes=_VMEM_LIMIT)


# ----------------------------------------------------------------------------
# Tiled bf16 matmul with f32 VMEM accumulator (used by every 1x1 / im2col conv)
# ----------------------------------------------------------------------------

def _matmul_kernel(x_ref, w_ref, o_ref, acc_ref):
    @pl.when(pl.program_id(2) == 0)
    def _():
        acc_ref[...] = jnp.zeros_like(acc_ref)

    acc_ref[...] += jnp.dot(x_ref[...], w_ref[...], preferred_element_type=jnp.float32)

    @pl.when(pl.program_id(2) == pl.num_programs(2) - 1)
    def _():
        o_ref[...] = acc_ref[...]


def pallas_matmul(x, w):
    """x: (M, K) f32 activations; w: (K, N) bf16 weights. Returns (M, N) f32."""
    M, K = x.shape
    Kw, N = w.shape
    assert K == Kw, (K, Kw)
    tm, Mp = _pick_tile(M, 8, 256)
    tk, Kp = _pick_tile(K, 128, 512)
    tn, Np = _pick_tile(N, 128, 256)

    xb = x.astype(jnp.bfloat16)
    if (Mp, Kp) != (M, K):
        xb = jnp.pad(xb, ((0, Mp - M), (0, Kp - K)))
    wb = w if (Kp, Np) == (K, N) else jnp.pad(w, ((0, Kp - K), (0, Np - N)))

    grid = (Mp // tm, Np // tn, Kp // tk)
    out = pl.pallas_call(
        _matmul_kernel,
        out_shape=jax.ShapeDtypeStruct((Mp, Np), jnp.float32),
        grid_spec=pltpu.PrefetchScalarGridSpec(
            num_scalar_prefetch=0,
            grid=grid,
            in_specs=[pl.BlockSpec((tm, tk), lambda i, j, k: (i, k)),
                      pl.BlockSpec((tk, tn), lambda i, j, k: (k, j))],
            out_specs=pl.BlockSpec((tm, tn), lambda i, j, k: (i, j)),
            scratch_shapes=[pltpu.VMEM((tm, tn), jnp.float32)]),
        compiler_params=_cparams("parallel", "parallel", "arbitrary"),
    )(xb, wb)
    if (Mp, Np) != (M, N):
        out = out[:M, :N]
    return out


# ----------------------------------------------------------------------------
# BatchNorm(+ReLU), residual add, fused add+ReLU — channel-tiled elementwise kernels
# ----------------------------------------------------------------------------

def _bn_kernel(x_ref, g_ref, b_ref, o_ref, *, relu):
    x = x_ref[...]                                            # (M, tc), M = N*H*W (not tiled)
    mean = jnp.mean(x, axis=0, keepdims=True)
    var = jnp.mean(jnp.square(x - mean), axis=0, keepdims=True)   # biased var (train-mode BN)
    y = (x - mean) * lax.rsqrt(var + EPS) * g_ref[...] + b_ref[...]
    if relu:
        y = jnp.maximum(y, 0.0)
    o_ref[...] = y


@functools.partial(jax.jit, static_argnames=("relu",))
def pallas_bn(x_nhwc, gamma, beta, relu):
    # Stats are per-channel over the full M axis (M is never tiled), so tiling C is exact.
    N, H, W, C = x_nhwc.shape
    M = N * H * W
    tc = _channel_tile(C)
    y = pl.pallas_call(
        functools.partial(_bn_kernel, relu=relu),
        out_shape=jax.ShapeDtypeStruct((M, C), jnp.float32),
        grid=(C // tc,),
        in_specs=[pl.BlockSpec((M, tc), lambda c: (0, c)),
                  pl.BlockSpec((1, tc), lambda c: (0, c)),
                  pl.BlockSpec((1, tc), lambda c: (0, c))],
        out_specs=pl.BlockSpec((M, tc), lambda c: (0, c)),
        compiler_params=_cparams("parallel"),
    )(x_nhwc.reshape(M, C), gamma.reshape(1, C), beta.reshape(1, C))
    return y.reshape(N, H, W, C)


def _add_kernel(a_ref, b_ref, o_ref):
    o_ref[...] = a_ref[...] + b_ref[...]


def _add_relu_kernel(a_ref, b_ref, s_ref, r_ref):
    s = a_ref[...] + b_ref[...]
    s_ref[...] = s
    r_ref[...] = jnp.maximum(s, 0.0)


@jax.jit
def pallas_add(a, b):
    shape = a.shape
    C = shape[-1]
    M = a.size // C
    tc = _channel_tile(C)
    y = pl.pallas_call(
        _add_kernel,
        out_shape=jax.ShapeDtypeStruct((M, C), jnp.float32),
        grid=(C // tc,),
        in_specs=[pl.BlockSpec((M, tc), lambda c: (0, c)),
                  pl.BlockSpec((M, tc), lambda c: (0, c))],
        out_specs=pl.BlockSpec((M, tc), lambda c: (0, c)),
        compiler_params=_cparams("parallel"),
    )(a.reshape(M, C), b.reshape(M, C))
    return y.reshape(shape)


@jax.jit
def pallas_add_relu(a, b):
    """Fused residual add + ReLU: returns (a+b, relu(a+b)) in one pass over HBM."""
    shape = a.shape
    C = shape[-1]
    M = a.size // C
    tc = _channel_tile(C)
    s, r = pl.pallas_call(
        _add_relu_kernel,
        out_shape=(jax.ShapeDtypeStruct((M, C), jnp.float32),
                   jax.ShapeDtypeStruct((M, C), jnp.float32)),
        grid=(C // tc,),
        in_specs=[pl.BlockSpec((M, tc), lambda c: (0, c)),
                  pl.BlockSpec((M, tc), lambda c: (0, c))],
        out_specs=(pl.BlockSpec((M, tc), lambda c: (0, c)),
                   pl.BlockSpec((M, tc), lambda c: (0, c))),
        compiler_params=_cparams("parallel"),
    )(a.reshape(M, C), b.reshape(M, C))
    return s.reshape(shape), r.reshape(shape)


# ----------------------------------------------------------------------------
# Depthwise 3x3 (dilated) convolution — channel-tiled tap accumulation
# ----------------------------------------------------------------------------

def _dw_kernel(x_ref, w_ref, o_ref, *, k, dilation):
    w = w_ref[...]                                            # (k, k, tc)
    ho, wo = o_ref.shape[1], o_ref.shape[2]
    acc = None
    for kh in range(k):
        for kw in range(k):
            tap = x_ref[:, kh * dilation:kh * dilation + ho,
                        kw * dilation:kw * dilation + wo, :] * w[kh, kw, :]
            acc = tap if acc is None else acc + tap           # first tap seeds the accumulator
    o_ref[...] = acc


@functools.partial(jax.jit, static_argnames=("stride", "padding", "dilation"))
def pallas_depthwise(x, w, stride, padding, dilation):
    # TODO(synk): stride>1 (3 small entry-flow layers) still computes the stride-1 result and
    # subsamples it; a direct strided-tap kernel would remove that remaining 4x waste.
    N, H, W, C = x.shape
    k = w.shape[0]
    xp = jnp.pad(x, ((0, 0), (padding, padding), (padding, padding), (0, 0)))
    Hp, Wp = H + 2 * padding, W + 2 * padding
    ho = Hp - (k - 1) * dilation
    wo = Wp - (k - 1) * dilation
    tc = _channel_tile(C)
    out = pl.pallas_call(
        functools.partial(_dw_kernel, k=k, dilation=dilation),
        out_shape=jax.ShapeDtypeStruct((N, ho, wo, C), jnp.float32),
        grid=(C // tc,),
        in_specs=[pl.BlockSpec((N, Hp, Wp, tc), lambda c: (0, 0, 0, c)),
                  pl.BlockSpec((k, k, tc), lambda c: (0, 0, c))],
        out_specs=pl.BlockSpec((N, ho, wo, tc), lambda c: (0, 0, 0, c)),
        compiler_params=_cparams("parallel"),
    )(xp, w)
    if stride > 1:
        out = out[:, ::stride, ::stride, :]
    return out


# ----------------------------------------------------------------------------
# Conv wrappers (reshape / im2col glue in JAX, matmul / depthwise in Pallas)
# ----------------------------------------------------------------------------

@functools.partial(jax.jit, static_argnames=("stride",))
def conv1x1(x, w_mat, stride=1):
    if stride > 1:
        x = x[:, ::stride, ::stride, :]
    N, H, W, Cin = x.shape
    y = pallas_matmul(x.reshape(N * H * W, Cin), w_mat)
    return y.reshape(N, H, W, -1)


@functools.partial(jax.jit, static_argnames=("k", "stride", "padding"))
def conv_kxk(x, w_mat, k, stride, padding):
    # TODO(synk): only the two tiny stem 3x3 convs use im2col; an in-kernel (kh,kw) tap-accumulating
    # matmul would avoid the k*k inflation, but Cin<=32 makes it negligible here.
    N, H, W, C = x.shape
    xp = jnp.pad(x, ((0, 0), (padding, padding), (padding, padding), (0, 0)))
    Hp, Wp = H + 2 * padding, W + 2 * padding
    Ho = (Hp - k) // stride + 1
    Wo = (Wp - k) // stride + 1
    patches = [xp[:, kh:kh + (Ho - 1) * stride + 1:stride,
                  kw:kw + (Wo - 1) * stride + 1:stride, :]
               for kh in range(k) for kw in range(k)]
    pat = jnp.stack(patches, axis=3).reshape(N * Ho * Wo, k * k * C)
    y = pallas_matmul(pat, w_mat)                            # w_mat rows in (kh, kw, cin) order
    return y.reshape(N, Ho, Wo, -1)


# ----------------------------------------------------------------------------
# Parameter construction (deterministic, mirrors the PyTorch module shapes)
# ----------------------------------------------------------------------------

class KeyGen:
    def __init__(self, key):
        self.key = key

    def __call__(self):
        self.key, sub = jax.random.split(self.key)
        return sub


def _kaiming(key, cout, cin_per_group, k):
    fan_out = cout * k * k                                   # kaiming_normal_(mode='fan_out', relu)
    std = (2.0 / fan_out) ** 0.5
    return std * jax.random.normal(key, (cout, cin_per_group, k, k), jnp.float32)


def init_bn(c):
    cp = _cpad(c)
    return dict(gamma=jnp.ones((cp,), jnp.float32), beta=jnp.zeros((cp,), jnp.float32))


def init_basic_conv(kg, cin, cout, k, stride=1, padding=0, groups=1, dilation=1):
    cin_p, cout_p = _cpad(cin), _cpad(cout)
    w_pt = _kaiming(kg(), cout, cin // groups, k)            # PyTorch layout (Cout, Cin/g, k, k)
    if groups == 1:
        w = jnp.transpose(w_pt, (2, 3, 1, 0))                # (k, k, cin, cout)
        w = jnp.pad(w, ((0, 0), (0, 0), (0, cin_p - cin), (0, cout_p - cout)))
        w = w.reshape(k * k * cin_p, cout_p).astype(jnp.bfloat16)     # (K, N) for the MXU
    else:                                                    # depthwise: groups == cin == cout
        w = jnp.transpose(w_pt[:, 0, :, :], (1, 2, 0))       # (k, k, C), f32 for the VPU
        w = jnp.pad(w, ((0, 0), (0, 0), (0, cout_p - cout)))
    return dict(w=w, bn=init_bn(cout), k=k, stride=stride, padding=padding,
                groups=groups, dilation=dilation)


def apply_basic_conv(p, x):
    if p['groups'] == 1:
        if p['k'] == 1:
            y = conv1x1(x, p['w'], stride=p['stride'])
        else:
            y = conv_kxk(x, p['w'], k=p['k'], stride=p['stride'], padding=p['padding'])
    else:
        y = pallas_depthwise(x, p['w'], stride=p['stride'],
                             padding=p['padding'], dilation=p['dilation'])
    return pallas_bn(y, p['bn']['gamma'], p['bn']['beta'], relu=True)


def init_dwsep(kg, cin, cout, k=3, stride=1, dilation=1):
    padding = dilation if dilation > k // 2 else k // 2
    return dict(dw=init_basic_conv(kg, cin, cin, k, stride=stride, padding=padding,
                                   groups=cin, dilation=dilation),
                pw=init_basic_conv(kg, cin, cout, 1))


def apply_dwsep(p, x):
    return apply_basic_conv(p['pw'], apply_basic_conv(p['dw'], x))


def init_shortcut(kg, cin, cout, stride):
    # nn.Conv2d(cin, cout, 1, stride) [bias zero-initialised -> omitted] + BatchNorm2d
    cin_p, cout_p = _cpad(cin), _cpad(cout)
    w_pt = _kaiming(kg(), cout, cin, 1)
    w = jnp.pad(w_pt.reshape(cout, cin).T,
                ((0, cin_p - cin), (0, cout_p - cout))).astype(jnp.bfloat16)
    return dict(w=w, stride=stride, bn=init_bn(cout))


def apply_shortcut(p, x):
    y = conv1x1(x, p['w'], stride=p['stride'])
    return pallas_bn(y, p['bn']['gamma'], p['bn']['beta'], relu=False)


def init_branch(kg, chans, strides, dilation=1):
    ds = [init_dwsep(kg, ci, co, stride=s, dilation=dilation)
          for (ci, co), s in zip(chans, strides)]
    bn = [init_bn(co) for (_, co) in chans]
    return dict(ds=ds, bn=bn)


def apply_branch(p, x, relu_flags):
    # Any leading ReLU of the reference branch is already folded into the caller's add_relu.
    for ds, bn, rf in zip(p['ds'], p['bn'], relu_flags):
        x = apply_dwsep(ds, x)
        x = pallas_bn(x, bn['gamma'], bn['beta'], relu=rf)
    return x


# ----------------------------------------------------------------------------
# Entry / Middle / Exit flows
# ----------------------------------------------------------------------------

def init_entry(kg, enf_s):
    return dict(
        conv1_a=init_basic_conv(kg, 3, 32, 3, stride=2, padding=1),
        conv1_b=init_basic_conv(kg, 32, 64, 3, stride=1, padding=1),
        r2=init_branch(kg, [(64, 128), (128, 128), (128, 128)], [1, 1, 2]),
        s2=init_shortcut(kg, 64, 128, 2),
        r3=init_branch(kg, [(128, 256), (256, 256), (256, 256)], [1, 1, 2]),
        s3=init_shortcut(kg, 128, 256, 2),
        r4=init_branch(kg, [(256, 728), (728, 728), (728, 728)], [1, 1, enf_s]),
        s4=init_shortcut(kg, 256, 728, enf_s),
    )


def apply_entry(p, x):
    x = apply_basic_conv(p['conv1_a'], x)
    x = apply_basic_conv(p['conv1_b'], x)

    r = apply_branch(p['r2'], x, (True, True, True))         # conv2_residual has no leading ReLU
    x, xr = pallas_add_relu(r, apply_shortcut(p['s2'], x))
    low = x                                                   # low-level features (pre-ReLU sum)

    r = apply_branch(p['r3'], xr, (True, False, True))        # leading ReLU came from add_relu
    x, xr = pallas_add_relu(r, apply_shortcut(p['s3'], x))

    r = apply_branch(p['r4'], xr, (True, False, True))
    x, xr = pallas_add_relu(r, apply_shortcut(p['s4'], x))
    return x, xr, low


def init_middle_block(kg, d):
    return init_branch(kg, [(728, 728)] * 3, [1, 1, 1], dilation=d)


def apply_middle_block(p, x, xr):
    r = apply_branch(p, xr, (True, True, True))
    return pallas_add_relu(x, r)                              # (new x, relu(new x)) for next block


def init_exit(kg, exf_d):
    d0, d1 = exf_d
    return dict(
        r1=init_branch(kg, [(728, 1024), (1024, 1024), (1024, 1024)], [1, 1, 1], dilation=d0),
        s1=init_shortcut(kg, 728, 1024, 1),
        c2=init_branch(kg, [(1024, 1536), (1536, 1536), (1536, 2048)], [1, 1, 1], dilation=d1),
    )


def apply_exit(p, x, xr):
    r = apply_branch(p['r1'], xr, (True, True, True))
    x = pallas_add(r, apply_shortcut(p['s1'], x))
    x = apply_branch(p['c2'], x, (True, True, True))          # conv2 has no leading ReLU
    return x


# ----------------------------------------------------------------------------
# Full Xception
# ----------------------------------------------------------------------------

def init_xception(key, output_stride=16):
    if output_stride == 16:
        enf_s, mdf_d, exf_d = 2, 1, (1, 2)
    elif output_stride == 8:
        enf_s, mdf_d, exf_d = 1, 2, (2, 4)
    else:
        raise ValueError('output_stride == 8 or 16!!')
    kg = KeyGen(key)
    return dict(
        entry=init_entry(kg, enf_s),
        middle=[init_middle_block(kg, mdf_d) for _ in range(16)],
        exit=init_exit(kg, exf_d),
    )


def xception_forward(params, x_nchw):
    # layout: NCHW (PyTorch convention) -> NHWC for the TPU kernels, back at the end.
    x = jnp.transpose(x_nchw, (0, 2, 3, 1)).astype(jnp.float32)
    x, xr, low = apply_entry(params['entry'], x)
    for mb in params['middle']:
        x, xr = apply_middle_block(mb, x, xr)
    x = apply_exit(params['exit'], x, xr)
    return (jnp.transpose(x, (0, 3, 1, 2)),
            jnp.transpose(low, (0, 3, 1, 2)))
    # TODO(synk): the reference's `print(...shape)` debug statements are side effects and omitted.


if __name__ == "__main__":
    key = jax.random.PRNGKey(0)
    pkey, xkey = jax.random.split(key)

    params = init_xception(pkey, output_stride=16)
    x = jax.random.normal(xkey, (2, 3, 16, 16), jnp.float32)   # NCHW, like the PyTorch module

    out, low = xception_forward(params, x)
    out = jax.block_until_ready(out)
    low = jax.block_until_ready(low)

    assert out.shape == (2, 2048, 1, 1), out.shape   # output_stride 16: 16 / 16 = 1
    assert low.shape == (2, 128, 4, 4), low.shape    # low-level features at stride 4
    assert bool(jnp.all(jnp.isfinite(out))) and bool(jnp.all(jnp.isfinite(low)))
    print("KERNEL_OK")
</pallas_src>

<mosaic_0001>
module attributes {stable_mosaic.version = 11 : i64} {
  func.func @_matmul_kernel(%arg0: i32, %arg1: i32, %arg2: i32, %arg3: memref<128x128xbf16, #tpu.memory_space<vmem>>, %arg4: memref<128x128xbf16, #tpu.memory_space<vmem>>, %arg5: memref<128x128xf32, #tpu.memory_space<vmem>>, %arg6: memref<128x128xf32, #tpu.memory_space<vmem>>) attributes {dimension_semantics = [#tpu.dimension_semantics<parallel>, #tpu.dimension_semantics<parallel>, #tpu.dimension_semantics<arbitrary>], iteration_bounds = array<i64: 1, 1, 1>, scalar_prefetch = 0 : i64, scratch_operands = 1 : i64, tpu.core_type = #tpu.core_type<tc>, window_params = [{transform_indices = @transform_0, window_bounds = array<i64: 128, 128>}, {transform_indices = @transform_1, window_bounds = array<i64: 128, 128>}, {transform_indices = @transform_2, window_bounds = array<i64: 128, 128>}]} {
    %c0_i32 = arith.constant 0 : i32
    %0 = arith.cmpi eq, %arg2, %c0_i32 : i32
    %1 = arith.extui %0 : i1 to i32
    %c0_i32_0 = arith.constant 0 : i32
    %2 = arith.cmpi ne, %1, %c0_i32_0 : i32
    scf.if %2 {
      %cst_10 = arith.constant 0.000000e+00 : f32
      %12 = vector.broadcast %cst_10 : f32 to vector<128x128xf32>
      %c0_11 = arith.constant 0 : index
      %c0_12 = arith.constant 0 : index
      %13 = vector.load %arg6[%c0_11, %c0_12] : memref<128x128xf32, #tpu.memory_space<vmem>>, vector<128x128xf32>
      tpu.vector_store %arg6[%c0_11, %c0_12], %12 {strides = array<i32>} : memref<128x128xf32, #tpu.memory_space<vmem>>, vector<128x128xf32>,
    } else {
    }
    %c0 = arith.constant 0 : index
    %c0_1 = arith.constant 0 : index
    %3 = vector.load %arg6[%c0, %c0_1] : memref<128x128xf32, #tpu.memory_space<vmem>>, vector<128x128xf32>
    %c0_2 = arith.constant 0 : index
    %c0_3 = arith.constant 0 : index
    %4 = vector.load %arg3[%c0_2, %c0_3] : memref<128x128xbf16, #tpu.memory_space<vmem>>, vector<128x128xbf16>
    %c0_4 = arith.constant 0 : index
    %c0_5 = arith.constant 0 : index
    %5 = vector.load %arg4[%c0_4, %c0_5] : memref<128x128xbf16, #tpu.memory_space<vmem>>, vector<128x128xbf16>
    %cst = arith.constant dense<0.000000e+00> : vector<128x128xf32>
    %6 = tpu.matmul %4, %5, %cst {dimension_numbers = #tpu.dot_dimension_numbers<[1], [0], [0], [1], [0, 0, 1, 1], [], []>} : vector<128x128xbf16>, vector<128x128xbf16>, vector<128x128xf32> -> vector<128x128xf32>
    %7 = arith.addf %3, %6 : vector<128x128xf32>
    %c0_6 = arith.constant 0 : index
    %c0_7 = arith.constant 0 : index
    %8 = vector.load %arg6[%c0_6, %c0_7] : memref<128x128xf32, #tpu.memory_space<vmem>>, vector<128x128xf32>
    tpu.vector_store %arg6[%c0_6, %c0_7], %7 {strides = array<i32>} : memref<128x128xf32, #tpu.memory_space<vmem>>, vector<128x128xf32>,
    %c0_i32_8 = arith.constant 0 : i32
    %9 = arith.cmpi eq, %arg2, %c0_i32_8 : i32
    %10 = arith.extui %9 : i1 to i32
    %c0_i32_9 = arith.constant 0 : i32
    %11 = arith.cmpi ne, %10, %c0_i32_9 : i32
    scf.if %11 {
      %c0_10 = arith.constant 0 : index
      %c0_11 = arith.constant 0 : index
      %12 = vector.load %arg6[%c0_10, %c0_11] : memref<128x128xf32, #tpu.memory_space<vmem>>, vector<128x128xf32>
      %c0_12 = arith.constant 0 : index
      %c0_13 = arith.constant 0 : index
      %13 = vector.load %arg5[%c0_12, %c0_13] : memref<128x128xf32, #tpu.memory_space<vmem>>, vector<128x128xf32>
      tpu.vector_store %arg5[%c0_12, %c0_13], %12 {strides = array<i32>} : memref<128x128xf32, #tpu.memory_space<vmem>>, vector<128x128xf32>,
    } else {
    }
    return
  }
  func.func @transform_0(%arg0: i32, %arg1: i32, %arg2: i32) -> (i32, i32) {
    %c0_i32 = arith.constant 0 : i32
    return %arg0, %arg2 : i32, i32
  }
  func.func @transform_1(%arg0: i32, %arg1: i32, %arg2: i32) -> (i32, i32) {
    %c0_i32 = arith.constant 0 : i32
    return %arg2, %arg1 : i32, i32
  }
  func.func @transform_2(%arg0: i32, %arg1: i32, %arg2: i32) -> (i32, i32) {
    %c0_i32 = arith.constant 0 : i32
    return %arg0, %arg1 : i32, i32
  }
}

</mosaic_0001>

<bundles_post_ra>
// kernel: conv_kxk.1
= control target key start
LH: loop header
LB: loop body
LE: loop exit
PB: predicated region body
PF: predicated region fallthrough
CT: control target
= control target key end

     0   :  { %s558_s0 = inlined_call_operand.vmem [shape: bf16[128,128], index: 0, kind: input, shape index: {}]   ;;  %s559_s1 = inlined_call_operand.vmem [shape: bf16[128,128], index: 1, kind: input, shape index: {}]   ;;  %s560_s2 = inlined_call_operand.hbm [shape: f32[128,128], index: 2, kind: output, shape index: {}]  }
   0x1   :  { %v440_v0 = vld [vmem:[%s559_s1] sm:$0xff]   ;;  %v441_v1 = vld [vmem:[%s559_s1 + $0x8] sm:$0xff]   ;;  %v442_v2 = vld [vmem:[%s559_s1 + $0x10] sm:$0xff]  }
   0x2   :  { %389 = vmatprep.subr.bf16.mxu0 %v440_v0  ;;  %421 = vmatprep.subr.bf16.mxu1 %v440_v0  ;;  %v443_v3 = vld [vmem:[%s559_s1 + $0x18] sm:$0xff]   ;;  %v448_v4 = vld [vmem:[%s558_s0] sm:$0xff]   ;;  %v445_v7 = vld [vmem:[%s559_s1 + $0x28] sm:$0xff]  }
   0x3   :  { %390 = vmatpush3.bf16.msra.mxu0 %v440_v0  ;;  %429 = vmatpush3.bf16.msra.mxu1 %v440_v0  ;;  %v449_v5 = vld [vmem:[%s558_s0 + $0x20] sm:$0xff]  }
   0x4   :  { %391 = vmatprep.subr.bf16.mxu0 %v441_v1  ;;  %422 = vmatprep.subr.bf16.mxu1 %v441_v1  ;;  %v444_v6 = vld [vmem:[%s559_s1 + $0x20] sm:$0xff]  }
   0x5   :  { %405 = vmatprep.mubr.bf16.mxu0 %v448_v4  ;;  %413 = vmatprep.mubr.bf16.mxu1 %v449_v5 }
   0x7   :  { %392 = vmatpush3.bf16.msra.mxu0 %v441_v1  ;;  %430 = vmatpush3.bf16.msra.mxu1 %v441_v1 }
   0x8   :  { %393 = vmatprep.subr.bf16.mxu0 %v442_v2  ;;  %423 = vmatprep.subr.bf16.mxu1 %v442_v2 }
   0xb   :  { %394 = vmatpush3.bf16.msra.mxu0 %v442_v2  ;;  %431 = vmatpush3.bf16.msra.mxu1 %v442_v2 }
   0xc   :  { %395 = vmatprep.subr.bf16.mxu0 %v443_v3  ;;  %424 = vmatprep.subr.bf16.mxu1 %v443_v3 }
   0xf   :  { %396 = vmatpush3.bf16.msra.mxu0 %v443_v3  ;;  %432 = vmatpush3.bf16.msra.mxu1 %v443_v3 }
  0x10   :  { %397 = vmatprep.subr.bf16.mxu0 %v444_v6  ;;  %425 = vmatprep.subr.bf16.mxu1 %v444_v6 }
  0x11   :  { %7 = vsyncpa [#allocation4], 0  ;;  %v446_v8 = vld [vmem:[%s559_s1 + $0x30] sm:$0xff]   ;;  %v447_v9 = vld [vmem:[%s559_s1 + $0x38] sm:$0xff]   ;;  %s480_s12 = smov [#allocation3]  }
  0x12   :  { %v450_v10 = vld [vmem:[%s558_s0 + $0x8] sm:$0xff]   ;;  %v452_v12 = vld [vmem:[%s558_s0 + $0x10] sm:$0xff]   ;;  %v454_v14 = vld [vmem:[%s558_s0 + $0x18] sm:$0xff]  }
  0x13   :  { %398 = vmatpush3.bf16.msra.mxu0 %v444_v6  ;;  %433 = vmatpush3.bf16.msra.mxu1 %v444_v6  ;;  %v451_v11 = vld [vmem:[%s558_s0 + $0x28] sm:$0xff]   ;;  %v453_v13 = vld [vmem:[%s558_s0 + $0x30] sm:$0xff]   ;;  %v455_v15 = vld [vmem:[%s558_s0 + $0x38] sm:$0xff]   ;;  %s346_s0 = sshll.u32 %s480_s12, 4  ;;  %s347_s0 = int_to_ptr.vmem [resolvable:$true] %s346_s0 }
  0x14   :  { %399 = vmatprep.subr.bf16.mxu0 %v445_v7  ;;  %426 = vmatprep.subr.bf16.mxu1 %v445_v7  ;;  %s456_s13 = scalar_lea.vmem %s347_s0, 2048  ;;  %p461_p1 = scmp.lt.s32.totalorder %s347_s0, %s347_s0 }
  0x15   :  { %p457_p0 = scmp.ne.s32.totalorder %s347_s0, %s456_s13  ;;  %p462_p2 = scmp.lt.s32.totalorder %s456_s13, %s456_s13 }
  0x17   :  { %400 = vmatpush3.bf16.msra.mxu0 %v445_v7  ;;  %434 = vmatpush3.bf16.msra.mxu1 %v445_v7  ;;  %p463_p3 = por %p462_p2, %p461_p1 }
  0x18   :  { %401 = vmatprep.subr.bf16.mxu0 %v446_v8  ;;  %427 = vmatprep.subr.bf16.mxu1 %v446_v8 }
  0x19   :  { %p464_p4 = pnand %p463_p3, %p457_p0 }
  0x1b   :  { %402 = vmatpush3.bf16.msra.mxu0 %v446_v8  ;;  %435 = vmatpush3.bf16.msra.mxu1 %v446_v8 }
  0x1c   :  { %403 = vmatprep.subr.bf16.mxu0 %v447_v9  ;;  %428 = vmatprep.subr.bf16.mxu1 %v447_v9 }
  0x1f   :  { %404 = vmatpush3.bf16.msra.mxu0 %v447_v9  ;;  %436 = vmatpush3.bf16.msra.mxu1 %v447_v9 }
  0x22   :  { %406 = vmatmul.mubr.bf16.vlgmr.msra.gmra.mrb[0].mxu0 %v450_v10  ;;  %414 = vmatmul.mubr.bf16.vlgmr.msra.gmra.mrb[0].mxu1 %v451_v11 }
  0x23   :  { %409 = vmatprep.mubr.bf16.mxu0 %v452_v12  ;;  %417 = vmatprep.mubr.bf16.mxu1 %v453_v13 }
  0x2a   :  { %410 = vmatmul.mubr.bf16.gmra.mrb[4].mxu0 %v454_v14  ;;  %418 = vmatmul.mubr.bf16.gmra.mrb[4].mxu1 %v455_v15 }
  0xf5   :  { %v407_v16 = vpop.f32.mrb[0].mxu0  ;;  %v415_v17 = vpop.f32.mrb[0].mxu1 }
  0xf6   :  { %327 = vst [vmem:[#allocation3 + $0x10] sm:$0xff] %v407_v16  ;;  %335 = vst [vmem:[#allocation3 + $0x50] sm:$0xff] %v415_v17  ;;  %v211_v18 = vpop.f32.mrb[1].mxu0  ;;  %v243_v19 = vpop.f32.mrb[1].mxu1 }
  0xf7   :  { %325 = vst [vmem:[#allocation3] sm:$0xff] %v211_v18  ;;  %333 = vst [vmem:[#allocation3 + $0x40] sm:$0xff] %v243_v19  ;;  %v408_v20 = vpop.f32.mrb[2].mxu0  ;;  %v416_v21 = vpop.f32.mrb[2].mxu1 }
  0xf8   :  { %328 = vst [vmem:[#allocation3 + $0x18] sm:$0xff] %v408_v20  ;;  %336 = vst [vmem:[#allocation3 + $0x58] sm:$0xff] %v416_v21  ;;  %v214_v22 = vpop.f32.mrb[3].mxu0  ;;  %v246_v23 = vpop.f32.mrb[3].mxu1 }
  0xf9   :  { %326 = vst [vmem:[#allocation3 + $0x8] sm:$0xff] %v214_v22  ;;  %334 = vst [vmem:[#allocation3 + $0x48] sm:$0xff] %v246_v23 }
  0xfd   :  { %v411_v24 = vpop.f32.mrb[4].mxu0  ;;  %v419_v25 = vpop.f32.mrb[4].mxu1 }
  0xfe   :  { %331 = vst [vmem:[#allocation3 + $0x30] sm:$0xff] %v411_v24  ;;  %339 = vst [vmem:[#allocation3 + $0x70] sm:$0xff] %v419_v25  ;;  %v227_v26 = vpop.f32.mrb[5].mxu0  ;;  %v259_v27 = vpop.f32.mrb[5].mxu1 }
  0xff   :  { %329 = vst [vmem:[#allocation3 + $0x20] sm:$0xff] %v227_v26  ;;  %337 = vst [vmem:[#allocation3 + $0x60] sm:$0xff] %v259_v27  ;;  %v412_v28 = vpop.f32.mrb[6].mxu0  ;;  %v420_v29 = vpop.f32.mrb[6].mxu1 }
 0x100   :  { %332 = vst [vmem:[#allocation3 + $0x38] sm:$0xff] %v412_v28  ;;  %340 = vst [vmem:[#allocation3 + $0x78] sm:$0xff] %v420_v29  ;;  %v230_v30 = vpop.f32.mrb[7].mxu0  ;;  %v262_v31 = vpop.f32.mrb[7].mxu1 }
 0x101   :  { %330 = vst [vmem:[#allocation3 + $0x28] sm:$0xff] %v230_v30  ;;  %338 = vst [vmem:[#allocation3 + $0x68] sm:$0xff] %v262_v31 }
 0x102   :  { %467 = shalt.err (!%p464_p4)
}
 0x103   :  { %s468_s16 = scalar_lea.hbm %s560_s2, 2048 }
 0x104   :  { %p469_p5 = scmp.ne.s32.totalorder %s560_s2, %s468_s16  ;;  %p472_p6 = scmp.lt.u32.totalorder %s468_s16, %s560_s2 }
 0x106   :  { %p474_p7 = pnand %p472_p6, %p469_p5 }
 0x108   :  { %477 = shalt.err (!%p474_p7)
}
 0x109   :  { %s481_s21 = smov 128   ;;  %s482_s22 = smov 8  }
 0x10a   :  { %352 = dma.vmem_to_hbm [thread:$0]  %s347_s0, 2048, %s560_s2, [#allocation4], %s481_s21, %s481_s21, %s482_s22  }
 0x10b   :  { %478 = dma.done.wait [#allocation4], 2048  }
 0x10c   :  { %479 = vsyncadd [#allocation4], 4294965248 }
 0x10d   :  { %356 = vsyncpa [#allocation4], 1 }

</bundles_post_ra>
